<compile_context>
chip_gen: v7x
topology: tpu7x:2x2x1
jax: 0.10.0
libtpu: 0.0.40
codegen_flags: <defaults>
</compile_context>

<pallas_src>
import math
import functools

import jax
import jax.numpy as jnp
from jax.experimental import pallas as pl
from jax.experimental.pallas import tpu as pltpu


# ----------------------------------------------------------------------------
# helpers
# ----------------------------------------------------------------------------
def _layer_norm(v, g, b, eps=1e-6):
    mu = jnp.mean(v, axis=-1, keepdims=True)
    var = jnp.mean((v - mu) ** 2, axis=-1, keepdims=True)
    return (v - mu) * jax.lax.rsqrt(var + eps) * g + b


# ----------------------------------------------------------------------------
# fused Pallas kernel: one encoder layer per grid step, activations resident
# ----------------------------------------------------------------------------
def fused_encoder_kernel(x_ref, pad_ref,
                         w_qkv_ref, wo_ref, w1_ref, w2_ref,
                         ln_ref, b_qkv_ref, b1_ref, b_oh_ref,
                         fin_ref,
                         out_ref, *, heads):
    """Grid = (batch_tile, layer). out_ref block is constant across the layer
    axis, so it is the VMEM-resident activation carried between layers."""
    l = pl.program_id(1)
    n_layers = pl.num_programs(1)

    # first layer iteration for this batch tile: seed the resident activation
    @pl.when(l == 0)
    def _():
        out_ref[...] = x_ref[...]

    bt, S, H = out_ref.shape
    d = H // heads
    scale = 1.0 / math.sqrt(d)

    x = out_ref[...].astype(jnp.float32).reshape(bt * S, H)     # (bt*S, H)

    ln = ln_ref[0]          # (4, H): ln1_g, ln1_b, ln2_g, ln2_b
    b_oh = b_oh_ref[0]      # (2, H): attention-out bias, FFN w2 bias

    # ---------------- self-attention (pre-norm) ----------------
    xn = _layer_norm(x, ln[0:1], ln[1:2]).astype(jnp.bfloat16)
    # fused wide QKV projection: one MXU pass, N = 3H
    qkv = jnp.dot(xn, w_qkv_ref[0],
                  preferred_element_type=jnp.float32) + b_qkv_ref[0]   # (bt*S, 3H)

    def heads_first(t):     # (bt*S, H) -> (heads*bt, S, d); leading-dim reshapes only
        return jnp.concatenate(
            [t[:, h * d:(h + 1) * d].reshape(bt, S, d) for h in range(heads)],
            axis=0)

    qh = heads_first(qkv[:, 0:H]) * scale          # fold 1/sqrt(d) into q
    kh = heads_first(qkv[:, H:2 * H])
    vh = heads_first(qkv[:, 2 * H:3 * H])

    scores = jnp.einsum('hqd,hkd->hqk',
                        qh.astype(jnp.bfloat16), kh.astype(jnp.bfloat16),
                        preferred_element_type=jnp.float32)    # (heads*bt, S, S)
    # additive key-padding bias (broadcast over heads and query positions)
    bias = pad_ref[...].astype(jnp.float32) * (-1e18)          # (bt, 1, S)
    scores = (scores.reshape(heads, bt, S, S) + bias[None]).reshape(heads * bt, S, S)

    # TODO(synk): for large S switch this block to a KV-tiled online-softmax
    # (flash-style); full (heads,S,S) scores only fit VMEM at small S.
    m = jnp.max(scores, axis=-1, keepdims=True)
    e = jnp.exp(scores - m)
    attn = e * pl.reciprocal(jnp.sum(e, axis=-1, keepdims=True), approx=True)

    ctx = jnp.einsum('hqk,hkd->hqd',
                     attn.astype(jnp.bfloat16), vh.astype(jnp.bfloat16),
                     preferred_element_type=jnp.float32)       # (heads*bt, S, d)
    # re-fuse heads into lanes (head-major column order) -> one wide out-proj matmul
    ctx2 = jnp.concatenate(
        [ctx[h * bt:(h + 1) * bt].reshape(bt * S, d) for h in range(heads)],
        axis=-1).astype(jnp.bfloat16)                          # (bt*S, H)
    attn_out = jnp.dot(ctx2, wo_ref[0],
                       preferred_element_type=jnp.float32) + b_oh[0:1]
    out1 = attn_out + x                                        # residual

    # ---------------- position-wise feed forward ----------------
    y = _layer_norm(out1, ln[2:3], ln[3:4]).astype(jnp.bfloat16)
    inter = jnp.maximum(
        jnp.dot(y, w1_ref[0], preferred_element_type=jnp.float32) + b1_ref[0], 0.0)
    ff = jnp.dot(inter.astype(jnp.bfloat16), w2_ref[0],
                 preferred_element_type=jnp.float32) + b_oh[1:2]
    new = ff + out1

    @pl.when(l < n_layers - 1)
    def _():
        out_ref[...] = new.reshape(bt, S, H).astype(out_ref.dtype)

    # final LayerNorm folded into the last layer iteration
    @pl.when(l == n_layers - 1)
    def _():
        fin = fin_ref[...]
        out_ref[...] = _layer_norm(new, fin[0:1], fin[1:2]
                                   ).reshape(bt, S, H).astype(out_ref.dtype)


# ----------------------------------------------------------------------------
# wrapper
# ----------------------------------------------------------------------------
_WKEYS = ('w_qkv', 'wo', 'w1', 'w2', 'ln', 'b_qkv', 'b1', 'b_oh')


def run_fused_encoder(x, pad, stacked, fin, heads, *, num_batch_tiles=None):
    B, S, H = x.shape
    L = stacked['w_qkv'].shape[0]
    d_ff = stacked['w1'].shape[-1]

    if num_batch_tiles is None:
        # Keep 2 parallel batch tiles when they divide B (v7x has 2 TensorCores);
        # otherwise fold the whole batch into one block (v5e/v6e: 1 TC anyway).
        num_batch_tiles = 2 if (B >= 2 and B % 2 == 0) else 1
    bt = B // num_batch_tiles

    weights = [stacked[k] for k in _WKEYS]

    in_specs = [
        pl.BlockSpec((bt, S, H), lambda b, l: (b, 0, 0)),      # resident activations
        pl.BlockSpec((bt, 1, S), lambda b, l: (b, 0, 0)),      # key-padding vector
    ]
    for w in weights:                                          # layer-stacked params
        blk = (1,) + w.shape[1:]
        in_specs.append(
            pl.BlockSpec(blk, lambda b, l, n=w.ndim - 1: (l,) + (0,) * n))
    in_specs.append(pl.BlockSpec((2, H), lambda b, l: (0, 0)))  # final LN gamma/beta

    # Advisory cost estimate (helps XLA schedule the surrounding glue ops).
    flops = int(2 * B * S * L * (4 * H * H + 2 * H * d_ff + 2 * S * H))
    transcendentals = int(B * heads * S * S * L)
    bytes_accessed = int(
        num_batch_tiles * sum(int(w.size) * w.dtype.itemsize for w in weights)
        + 2 * int(x.size) * x.dtype.itemsize
        + int(pad.size) * pad.dtype.itemsize
        + int(fin.size) * fin.dtype.itemsize)

    # TODO(synk): for scaled configs (H, d_ff multiples of 128, large L) set
    # pltpu.CompilerParams(vmem_limit_bytes=...) and add K/N weight tiling so the
    # double-buffered per-layer weight set stays under v7x's 64 MiB VMEM.
    return pl.pallas_call(
        functools.partial(fused_encoder_kernel, heads=heads),
        out_shape=jax.ShapeDtypeStruct((B, S, H), jnp.float32),
        grid=(num_batch_tiles, L),
        in_specs=in_specs,
        out_specs=pl.BlockSpec((bt, S, H), lambda b, l: (b, 0, 0)),
        compiler_params=pltpu.CompilerParams(
            dimension_semantics=("parallel", "arbitrary")),
        cost_estimate=pl.CostEstimate(flops=flops,
                                      transcendentals=transcendentals,
                                      bytes_accessed=bytes_accessed),
    )(x, pad, *weights, fin)


# ----------------------------------------------------------------------------
# parameter construction (deterministic, synthetic) + host-side prep
# ----------------------------------------------------------------------------
def make_params(key, vocab_size, emb_size, hidden_size, d_ff, num_layers):
    keys = jax.random.split(key, 1 + num_layers)

    # Embedding table; row 0 (padding_idx) is zero, like nn.Embedding(padding_idx=0).
    emb = 0.05 * jax.random.normal(keys[0], (vocab_size, emb_size), jnp.float32)
    emb = emb.at[0].set(0.0)

    def linear(k, din, dout):
        kw, kb = jax.random.split(k)
        w = 0.05 * jax.random.normal(kw, (din, dout), jnp.float32)  # pre-transposed
        b = 0.05 * jax.random.normal(kb, (1, dout), jnp.float32)
        return w, b

    layers = []
    for li in range(num_layers):
        ks = jax.random.split(keys[1 + li], 6)
        wq, bq = linear(ks[0], hidden_size, hidden_size)
        wk, bk = linear(ks[1], hidden_size, hidden_size)
        wv, bv = linear(ks[2], hidden_size, hidden_size)
        wo, bo = linear(ks[3], hidden_size, hidden_size)
        w1, b1 = linear(ks[4], hidden_size, d_ff)
        w2, b2 = linear(ks[5], d_ff, hidden_size)
        layers.append(dict(
            ln1_g=jnp.ones((1, hidden_size), jnp.float32),
            ln1_b=jnp.zeros((1, hidden_size), jnp.float32),
            wq=wq, bq=bq, wk=wk, bk=bk, wv=wv, bv=bv, wo=wo, bo=bo,
            ln2_g=jnp.ones((1, hidden_size), jnp.float32),
            ln2_b=jnp.zeros((1, hidden_size), jnp.float32),
            w1=w1, b1=b1, w2=w2, b2=b2))

    final_g = jnp.ones((1, hidden_size), jnp.float32)
    final_b = jnp.zeros((1, hidden_size), jnp.float32)
    return emb, layers, final_g, final_b


def stack_layer_params(layers):
    """Host-side prep: fuse Q/K/V into one lane-dense (H, 3H) weight, keep WO /
    W1 / W2 as full-width bf16 matrices, and pack the 10 tiny LN/bias vectors
    into 4 small f32 arrays; stack everything over the layer axis."""
    prepped = []
    for lp in layers:
        prepped.append(dict(
            w_qkv=jnp.concatenate([lp['wq'], lp['wk'], lp['wv']],
                                  axis=1).astype(jnp.bfloat16),       # (H, 3H)
            wo=lp['wo'].astype(jnp.bfloat16),                         # (H, H)
            w1=lp['w1'].astype(jnp.bfloat16),                         # (H, d_ff)
            w2=lp['w2'].astype(jnp.bfloat16),                         # (d_ff, H)
            ln=jnp.concatenate([lp['ln1_g'], lp['ln1_b'],
                                lp['ln2_g'], lp['ln2_b']], axis=0),   # (4, H)
            b_qkv=jnp.concatenate([lp['bq'], lp['bk'], lp['bv']],
                                  axis=1),                            # (1, 3H)
            b1=lp['b1'],                                              # (1, d_ff)
            b_oh=jnp.concatenate([lp['bo'], lp['b2']], axis=0)))      # (2, H)
    return {k: jnp.stack([p[k] for p in prepped], axis=0) for k in _WKEYS}


def make_positional_encoding(max_len, dim):
    pos = jnp.arange(max_len, dtype=jnp.float32)[:, None]
    div = jnp.exp(jnp.arange(0, dim, 2, dtype=jnp.float32)
                  * (-math.log(10000.0) / dim))
    pe = jnp.zeros((max_len, dim), jnp.float32)
    pe = pe.at[:, 0::2].set(jnp.sin(pos * div))
    pe = pe.at[:, 1::2].set(jnp.cos(pos * div))
    return pe


# ----------------------------------------------------------------------------
# Full TransformerEncoder forward
# ----------------------------------------------------------------------------
def transformer_encoder_forward(src, emb_table, pe, stacked, fin,
                                heads, padding_idx=0):
    B, S = src.shape
    emb_size = emb_table.shape[1]

    # Embedding + positional encoding (glue); dropout is identity in eval mode.
    embed = jnp.take(emb_table, src, axis=0)                 # (B, S, H)
    out = embed * math.sqrt(emb_size) + pe[None, :S, :]

    # Key-padding vector (B, 1, S): 1.0 where the key position is padding.
    pad = (src == padding_idx).astype(jnp.float32)[:, None, :]

    return run_fused_encoder(out.astype(jnp.float32), pad, stacked, fin, heads)


# ----------------------------------------------------------------------------
# Main
# ----------------------------------------------------------------------------
if __name__ == "__main__":
    # config (small, consistent with the module)
    vocab_size = 50
    emb_size = 32
    hidden_size = 32      # must equal emb_size (embedding feeds the layers)
    heads = 4
    d_ff = 64
    enc_num_layers = 2
    B, S = 2, 8

    key = jax.random.PRNGKey(0)
    k_params, k_src = jax.random.split(key)

    emb_table, layer_params, final_g, final_b = make_params(
        k_params, vocab_size, emb_size, hidden_size, d_ff, enc_num_layers)
    stacked = stack_layer_params(layer_params)
    fin = jnp.concatenate([final_g, final_b], axis=0)        # (2, H)
    pe = make_positional_encoding(1000, emb_size)

    # deterministic source tokens with trailing padding (id 0)
    src = jax.random.randint(k_src, (B, S), 1, vocab_size, dtype=jnp.int32)
    src = src.at[0, 5:].set(0)
    src = src.at[1, 7:].set(0)

    out = transformer_encoder_forward(
        src, emb_table, pe, stacked, fin, heads, padding_idx=0)
    out = jax.block_until_ready(out)

    assert out.shape == (B, S, hidden_size)
    assert bool(jnp.all(jnp.isfinite(out)))
    print("KERNEL_OK")
</pallas_src>

<mosaic_0001>
module attributes {stable_mosaic.version = 11 : i64} {
  func.func @fused_encoder_kernel(%arg0: i32, %arg1: i32, %arg2: memref<1x8x32xf32, #tpu.memory_space<vmem>>, %arg3: memref<1x1x8xf32, #tpu.memory_space<vmem>>, %arg4: memref<1x32x96xbf16, #tpu.memory_space<vmem>>, %arg5: memref<1x32x32xbf16, #tpu.memory_space<vmem>>, %arg6: memref<1x32x64xbf16, #tpu.memory_space<vmem>>, %arg7: memref<1x64x32xbf16, #tpu.memory_space<vmem>>, %arg8: memref<1x4x32xf32, #tpu.memory_space<vmem>>, %arg9: memref<1x1x96xf32, #tpu.memory_space<vmem>>, %arg10: memref<1x1x64xf32, #tpu.memory_space<vmem>>, %arg11: memref<1x2x32xf32, #tpu.memory_space<vmem>>, %arg12: memref<2x32xf32, #tpu.memory_space<vmem>>, %arg13: memref<1x8x32xf32, #tpu.memory_space<vmem>>) attributes {dimension_semantics = [#tpu.dimension_semantics<parallel>, #tpu.dimension_semantics<arbitrary>], iteration_bounds = array<i64: 2, 2>, scalar_prefetch = 0 : i64, scratch_operands = 0 : i64, tpu.core_type = #tpu.core_type<tc>, window_params = [{transform_indices = @transform_0, window_bounds = array<i64: 1, 8, 32>}, {transform_indices = @transform_1, window_bounds = array<i64: 1, 1, 8>}, {transform_indices = @transform_2, window_bounds = array<i64: 1, 32, 96>}, {transform_indices = @transform_3, window_bounds = array<i64: 1, 32, 32>}, {transform_indices = @transform_4, window_bounds = array<i64: 1, 32, 64>}, {transform_indices = @transform_5, window_bounds = array<i64: 1, 64, 32>}, {transform_indices = @transform_6, window_bounds = array<i64: 1, 4, 32>}, {transform_indices = @transform_7, window_bounds = array<i64: 1, 1, 96>}, {transform_indices = @transform_8, window_bounds = array<i64: 1, 1, 64>}, {transform_indices = @transform_9, window_bounds = array<i64: 1, 2, 32>}, {pipeline_mode = #tpu.pipeline_mode<synchronous>, transform_indices = @transform_10, window_bounds = array<i64: 2, 32>}, {transform_indices = @transform_11, window_bounds = array<i64: 1, 8, 32>}]} {
    %c0_i32 = arith.constant 0 : i32
    %0 = arith.cmpi eq, %arg1, %c0_i32 : i32
    %1 = arith.extui %0 : i1 to i32
    %c0_i32_0 = arith.constant 0 : i32
    %2 = arith.cmpi ne, %1, %c0_i32_0 : i32
    scf.if %2 {
      %c0_53 = arith.constant 0 : index
      %c0_54 = arith.constant 0 : index
      %c0_55 = arith.constant 0 : index
      %162 = vector.load %arg2[%c0_53, %c0_54, %c0_55] : memref<1x8x32xf32, #tpu.memory_space<vmem>>, vector<1x8x32xf32>
      %c0_56 = arith.constant 0 : index
      %c0_57 = arith.constant 0 : index
      %c0_58 = arith.constant 0 : index
      %163 = vector.load %arg13[%c0_56, %c0_57, %c0_58] : memref<1x8x32xf32, #tpu.memory_space<vmem>>, vector<1x8x32xf32>
      tpu.vector_store %arg13[%c0_56, %c0_57, %c0_58], %162 {strides = array<i32>} : memref<1x8x32xf32, #tpu.memory_space<vmem>>, vector<1x8x32xf32>,
    } else {
    }
    %c0 = arith.constant 0 : index
    %c0_1 = arith.constant 0 : index
    %c0_2 = arith.constant 0 : index
    %3 = vector.load %arg13[%c0, %c0_1, %c0_2] : memref<1x8x32xf32, #tpu.memory_space<vmem>>, vector<1x8x32xf32>
    %4 = vector.shape_cast %3 : vector<1x8x32xf32> to vector<8x32xf32>
    %c0_3 = arith.constant 0 : index
    %c0_4 = arith.constant 0 : index
    %c0_5 = arith.constant 0 : index
    %5 = vector.load %arg8[%c0_3, %c0_4, %c0_5] : memref<1x4x32xf32, #tpu.memory_space<vmem>>, vector<1x4x32xf32>
    %6 = vector.shape_cast %5 : vector<1x4x32xf32> to vector<4x32xf32>
    %c0_6 = arith.constant 0 : index
    %c0_7 = arith.constant 0 : index
    %c0_8 = arith.constant 0 : index
    %7 = vector.load %arg11[%c0_6, %c0_7, %c0_8] : memref<1x2x32xf32, #tpu.memory_space<vmem>>, vector<1x2x32xf32>
    %8 = vector.shape_cast %7 : vector<1x2x32xf32> to vector<2x32xf32>
    %9 = vector.extract_strided_slice %6 {offsets = [0, 0], sizes = [1, 32], strides = [1, 1]} : vector<4x32xf32> to vector<1x32xf32>
    %10 = vector.extract_strided_slice %6 {offsets = [1, 0], sizes = [1, 32], strides = [1, 1]} : vector<4x32xf32> to vector<1x32xf32>
    %cst = arith.constant dense<0.000000e+00> : vector<8xf32>
    %11 = vector.multi_reduction <add>, %4, %cst [1] : vector<8x32xf32> to vector<8xf32>
    %12 = vector.shape_cast %11 : vector<8xf32> to vector<8x1xf32>
    %cst_9 = arith.constant 3.200000e+01 : f32
    %13 = vector.broadcast %cst_9 : f32 to vector<8x1xf32>
    %14 = arith.divf %12, %13 : vector<8x1xf32>
    %15 = vector.broadcast %14 : vector<8x1xf32> to vector<8x32xf32>
    %16 = arith.subf %4, %15 : vector<8x32xf32>
    %17 = arith.mulf %16, %16 : vector<8x32xf32>
    %cst_10 = arith.constant dense<0.000000e+00> : vector<8xf32>
    %18 = vector.multi_reduction <add>, %17, %cst_10 [1] : vector<8x32xf32> to vector<8xf32>
    %19 = vector.shape_cast %18 : vector<8xf32> to vector<8x1xf32>
    %cst_11 = arith.constant 3.200000e+01 : f32
    %20 = vector.broadcast %cst_11 : f32 to vector<8x1xf32>
    %21 = arith.divf %19, %20 : vector<8x1xf32>
    %22 = vector.broadcast %14 : vector<8x1xf32> to vector<8x32xf32>
    %23 = arith.subf %4, %22 : vector<8x32xf32>
    %cst_12 = arith.constant 9.99999997E-7 : f32
    %24 = vector.broadcast %cst_12 : f32 to vector<8x1xf32>
    %25 = arith.addf %21, %24 : vector<8x1xf32>
    %26 = math.rsqrt %25 : vector<8x1xf32>
    %27 = vector.broadcast %26 : vector<8x1xf32> to vector<8x32xf32>
    %28 = arith.mulf %23, %27 : vector<8x32xf32>
    %29 = vector.broadcast %9 : vector<1x32xf32> to vector<8x32xf32>
    %30 = arith.mulf %28, %29 : vector<8x32xf32>
    %31 = vector.broadcast %10 : vector<1x32xf32> to vector<8x32xf32>
    %32 = arith.addf %30, %31 : vector<8x32xf32>
    %33 = arith.truncf %32 : vector<8x32xf32> to vector<8x32xbf16>
    %c0_13 = arith.constant 0 : index
    %c0_14 = arith.constant 0 : index
    %c0_15 = arith.constant 0 : index
    %34 = vector.load %arg4[%c0_13, %c0_14, %c0_15] : memref<1x32x96xbf16, #tpu.memory_space<vmem>>, vector<1x32x96xbf16>
    %35 = vector.shape_cast %34 : vector<1x32x96xbf16> to vector<32x96xbf16>
    %cst_16 = arith.constant dense<0.000000e+00> : vector<8x96xf32>
    %36 = tpu.matmul %33, %35, %cst_16 {dimension_numbers = #tpu.dot_dimension_numbers<[1], [0], [0], [1], [0, 0, 1, 1], [], []>} : vector<8x32xbf16>, vector<32x96xbf16>, vector<8x96xf32> -> vector<8x96xf32>
    %c0_17 = arith.constant 0 : index
    %c0_18 = arith.constant 0 : index
    %c0_19 = arith.constant 0 : index
    %37 = vector.load %arg9[%c0_17, %c0_18, %c0_19] : memref<1x1x96xf32, #tpu.memory_space<vmem>>, vector<1x1x96xf32>
    %38 = vector.shape_cast %37 : vector<1x1x96xf32> to vector<1x96xf32>
    %39 = vector.broadcast %38 : vector<1x96xf32> to vector<8x96xf32>
    %40 = arith.addf %36, %39 : vector<8x96xf32>
    %41 = vector.extract_strided_slice %40 {offsets = [0, 0], sizes = [8, 32], strides = [1, 1]} : vector<8x96xf32> to vector<8x32xf32>
    %42 = vector.extract_strided_slice %41 {offsets = [0, 0], sizes = [8, 8], strides = [1, 1]} : vector<8x32xf32> to vector<8x8xf32>
    %43 = vector.shape_cast %42 : vector<8x8xf32> to vector<1x8x8xf32>
    %44 = vector.extract_strided_slice %41 {offsets = [0, 8], sizes = [8, 8], strides = [1, 1]} : vector<8x32xf32> to vector<8x8xf32>
    %45 = vector.shape_cast %44 : vector<8x8xf32> to vector<1x8x8xf32>
    %46 = vector.extract_strided_slice %41 {offsets = [0, 16], sizes = [8, 8], strides = [1, 1]} : vector<8x32xf32> to vector<8x8xf32>
    %47 = vector.shape_cast %46 : vector<8x8xf32> to vector<1x8x8xf32>
    %48 = vector.extract_strided_slice %41 {offsets = [0, 24], sizes = [8, 8], strides = [1, 1]} : vector<8x32xf32> to vector<8x8xf32>
    %49 = vector.shape_cast %48 : vector<8x8xf32> to vector<1x8x8xf32>
    %50 = tpu.concatenate %43, %45, %47, %49 in 0 : vector<1x8x8xf32>, vector<1x8x8xf32>, vector<1x8x8xf32>, vector<1x8x8xf32> -> vector<4x8x8xf32>
    %cst_20 = arith.constant 0.353553385 : f32
    %51 = vector.broadcast %cst_20 : f32 to vector<4x8x8xf32>
    %52 = arith.mulf %50, %51 : vector<4x8x8xf32>
    %53 = vector.extract_strided_slice %40 {offsets = [0, 32], sizes = [8, 32], strides = [1, 1]} : vector<8x96xf32> to vector<8x32xf32>
    %54 = vector.extract_strided_slice %53 {offsets = [0, 0], sizes = [8, 8], strides = [1, 1]} : vector<8x32xf32> to vector<8x8xf32>
    %55 = vector.shape_cast %54 : vector<8x8xf32> to vector<1x8x8xf32>
    %56 = vector.extract_strided_slice %53 {offsets = [0, 8], sizes = [8, 8], strides = [1, 1]} : vector<8x32xf32> to vector<8x8xf32>
    %57 = vector.shape_cast %56 : vector<8x8xf32> to vector<1x8x8xf32>
    %58 = vector.extract_strided_slice %53 {offsets = [0, 16], sizes = [8, 8], strides = [1, 1]} : vector<8x32xf32> to vector<8x8xf32>
    %59 = vector.shape_cast %58 : vector<8x8xf32> to vector<1x8x8xf32>
    %60 = vector.extract_strided_slice %53 {offsets = [0, 24], sizes = [8, 8], strides = [1, 1]} : vector<8x32xf32> to vector<8x8xf32>
    %61 = vector.shape_cast %60 : vector<8x8xf32> to vector<1x8x8xf32>
    %62 = tpu.concatenate %55, %57, %59, %61 in 0 : vector<1x8x8xf32>, vector<1x8x8xf32>, vector<1x8x8xf32>, vector<1x8x8xf32> -> vector<4x8x8xf32>
    %63 = vector.extract_strided_slice %40 {offsets = [0, 64], sizes = [8, 32], strides = [1, 1]} : vector<8x96xf32> to vector<8x32xf32>
    %64 = vector.extract_strided_slice %63 {offsets = [0, 0], sizes = [8, 8], strides = [1, 1]} : vector<8x32xf32> to vector<8x8xf32>
    %65 = vector.shape_cast %64 : vector<8x8xf32> to vector<1x8x8xf32>
    %66 = vector.extract_strided_slice %63 {offsets = [0, 8], sizes = [8, 8], strides = [1, 1]} : vector<8x32xf32> to vector<8x8xf32>
    %67 = vector.shape_cast %66 : vector<8x8xf32> to vector<1x8x8xf32>
    %68 = vector.extract_strided_slice %63 {offsets = [0, 16], sizes = [8, 8], strides = [1, 1]} : vector<8x32xf32> to vector<8x8xf32>
    %69 = vector.shape_cast %68 : vector<8x8xf32> to vector<1x8x8xf32>
    %70 = vector.extract_strided_slice %63 {offsets = [0, 24], sizes = [8, 8], strides = [1, 1]} : vector<8x32xf32> to vector<8x8xf32>
    %71 = vector.shape_cast %70 : vector<8x8xf32> to vector<1x8x8xf32>
    %72 = tpu.concatenate %65, %67, %69, %71 in 0 : vector<1x8x8xf32>, vector<1x8x8xf32>, vector<1x8x8xf32>, vector<1x8x8xf32> -> vector<4x8x8xf32>
    %73 = arith.truncf %52 : vector<4x8x8xf32> to vector<4x8x8xbf16>
    %74 = arith.truncf %62 : vector<4x8x8xf32> to vector<4x8x8xbf16>
    "tpu.trace_start"() <{level = 10 : i32, message = "hqd,hkd->hqk"}> : () -> ()
    %cst_21 = arith.constant dense<0.000000e+00> : vector<4x8x8xf32>
    %75 = tpu.matmul %73, %74, %cst_21 {dimension_numbers = #tpu.dot_dimension_numbers<[2], [2], [1], [1], [0, 0, 0, 1, 1, 1], [0], [0]>} : vector<4x8x8xbf16>, vector<4x8x8xbf16>, vector<4x8x8xf32> -> vector<4x8x8xf32>
    "tpu.trace_stop"() : () -> ()
    %c0_22 = arith.constant 0 : index
    %c0_23 = arith.constant 0 : index
    %c0_24 = arith.constant 0 : index
    %76 = vector.load %arg3[%c0_22, %c0_23, %c0_24] : memref<1x1x8xf32, #tpu.memory_space<vmem>>, vector<1x1x8xf32>
    %cst_25 = arith.constant -9.99999984E+17 : f32
    %77 = vector.broadcast %cst_25 : f32 to vector<1x1x8xf32>
    %78 = arith.mulf %76, %77 : vector<1x1x8xf32>
    %79 = vector.shape_cast %75 : vector<4x8x8xf32> to vector<4x1x8x8xf32>
    %80 = vector.shape_cast %78 : vector<1x1x8xf32> to vector<1x1x1x8xf32>
    %81 = vector.broadcast %80 : vector<1x1x1x8xf32> to vector<4x1x8x8xf32>
    %82 = arith.addf %79, %81 : vector<4x1x8x8xf32>
    %83 = vector.shape_cast %82 : vector<4x1x8x8xf32> to vector<4x8x8xf32>
    %cst_26 = arith.constant dense<0xFF800000> : vector<4x8xf32>
    %84 = vector.multi_reduction <maximumf>, %83, %cst_26 [2] : vector<4x8x8xf32> to vector<4x8xf32>
    %85 = vector.shape_cast %84 : vector<4x8xf32> to vector<4x8x1xf32>
    %86 = vector.broadcast %85 : vector<4x8x1xf32> to vector<4x8x8xf32>
    %87 = arith.subf %83, %86 : vector<4x8x8xf32>
    %88 = math.exp %87 : vector<4x8x8xf32>
    %cst_27 = arith.constant dense<0.000000e+00> : vector<4x8xf32>
    %89 = vector.multi_reduction <add>, %88, %cst_27 [2] : vector<4x8x8xf32> to vector<4x8xf32>
    %90 = vector.shape_cast %89 : vector<4x8xf32> to vector<4x8x1xf32>
    %91 = tpu.reciprocal %90 {approx = true} : vector<4x8x1xf32> -> vector<4x8x1xf32>
    %92 = vector.broadcast %91 : vector<4x8x1xf32> to vector<4x8x8xf32>
    %93 = arith.mulf %88, %92 : vector<4x8x8xf32>
    %94 = arith.truncf %93 : vector<4x8x8xf32> to vector<4x8x8xbf16>
    %95 = arith.truncf %72 : vector<4x8x8xf32> to vector<4x8x8xbf16>
    "tpu.trace_start"() <{level = 10 : i32, message = "hqk,hkd->hqd"}> : () -> ()
    %cst_28 = arith.constant dense<0.000000e+00> : vector<4x8x8xf32>
    %96 = tpu.matmul %94, %95, %cst_28 {dimension_numbers = #tpu.dot_dimension_numbers<[2], [1], [1], [2], [0, 0, 0, 1, 1, 2], [0], [0]>} : vector<4x8x8xbf16>, vector<4x8x8xbf16>, vector<4x8x8xf32> -> vector<4x8x8xf32>
    "tpu.trace_stop"() : () -> ()
    %97 = vector.extract_strided_slice %96 {offsets = [0, 0, 0], sizes = [1, 8, 8], strides = [1, 1, 1]} : vector<4x8x8xf32> to vector<1x8x8xf32>
    %98 = vector.shape_cast %97 : vector<1x8x8xf32> to vector<8x8xf32>
    %99 = vector.extract_strided_slice %96 {offsets = [1, 0, 0], sizes = [1, 8, 8], strides = [1, 1, 1]} : vector<4x8x8xf32> to vector<1x8x8xf32>
    %100 = vector.shape_cast %99 : vector<1x8x8xf32> to vector<8x8xf32>
    %101 = vector.extract_strided_slice %96 {offsets = [2, 0, 0], sizes = [1, 8, 8], strides = [1, 1, 1]} : vector<4x8x8xf32> to vector<1x8x8xf32>
    %102 = vector.shape_cast %101 : vector<1x8x8xf32> to vector<8x8xf32>
    %103 = vector.extract_strided_slice %96 {offsets = [3, 0, 0], sizes = [1, 8, 8], strides = [1, 1, 1]} : vector<4x8x8xf32> to vector<1x8x8xf32>
    %104 = vector.shape_cast %103 : vector<1x8x8xf32> to vector<8x8xf32>
    %105 = tpu.concatenate %98, %100, %102, %104 in 1 : vector<8x8xf32>, vector<8x8xf32>, vector<8x8xf32>, vector<8x8xf32> -> vector<8x32xf32>
    %106 = arith.truncf %105 : vector<8x32xf32> to vector<8x32xbf16>
    %c0_29 = arith.constant 0 : index
    %c0_30 = arith.constant 0 : index
    %c0_31 = arith.constant 0 : index
    %107 = vector.load %arg5[%c0_29, %c0_30, %c0_31] : memref<1x32x32xbf16, #tpu.memory_space<vmem>>, vector<1x32x32xbf16>
    %108 = vector.shape_cast %107 : vector<1x32x32xbf16> to vector<32x32xbf16>
    %cst_32 = arith.constant dense<0.000000e+00> : vector<8x32xf32>
    %109 = tpu.matmul %106, %108, %cst_32 {dimension_numbers = #tpu.dot_dimension_numbers<[1], [0], [0], [1], [0, 0, 1, 1], [], []>} : vector<8x32xbf16>, vector<32x32xbf16>, vector<8x32xf32> -> vector<8x32xf32>
    %110 = vector.extract_strided_slice %8 {offsets = [0, 0], sizes = [1, 32], strides = [1, 1]} : vector<2x32xf32> to vector<1x32xf32>
    %111 = vector.broadcast %110 : vector<1x32xf32> to vector<8x32xf32>
    %112 = arith.addf %109, %111 : vector<8x32xf32>
    %113 = arith.addf %112, %4 : vector<8x32xf32>
    %114 = vector.extract_strided_slice %6 {offsets = [2, 0], sizes = [1, 32], strides = [1, 1]} : vector<4x32xf32> to vector<1x32xf32>
    %115 = vector.extract_strided_slice %6 {offsets = [3, 0], sizes = [1, 32], strides = [1, 1]} : vector<4x32xf32> to vector<1x32xf32>
    %cst_33 = arith.constant dense<0.000000e+00> : vector<8xf32>
    %116 = vector.multi_reduction <add>, %113, %cst_33 [1] : vector<8x32xf32> to vector<8xf32>
    %117 = vector.shape_cast %116 : vector<8xf32> to vector<8x1xf32>
    %cst_34 = arith.constant 3.200000e+01 : f32
    %118 = vector.broadcast %cst_34 : f32 to vector<8x1xf32>
    %119 = arith.divf %117, %118 : vector<8x1xf32>
    %120 = vector.broadcast %119 : vector<8x1xf32> to vector<8x32xf32>
    %121 = arith.subf %113, %120 : vector<8x32xf32>
    %122 = arith.mulf %121, %121 : vector<8x32xf32>
    %cst_35 = arith.constant dense<0.000000e+00> : vector<8xf32>
    %123 = vector.multi_reduction <add>, %122, %cst_35 [1] : vector<8x32xf32> to vector<8xf32>
    %124 = vector.shape_cast %123 : vector<8xf32> to vector<8x1xf32>
    %cst_36 = arith.constant 3.200000e+01 : f32
    %125 = vector.broadcast %cst_36 : f32 to vector<8x1xf32>
    %126 = arith.divf %124, %125 : vector<8x1xf32>
    %127 = vector.broadcast %119 : vector<8x1xf32> to vector<8x32xf32>
    %128 = arith.subf %113, %127 : vector<8x32xf32>
    %cst_37 = arith.constant 9.99999997E-7 : f32
    %129 = vector.broadcast %cst_37 : f32 to vector<8x1xf32>
    %130 = arith.addf %126, %129 : vector<8x1xf32>
    %131 = math.rsqrt %130 : vector<8x1xf32>
    %132 = vector.broadcast %131 : vector<8x1xf32> to vector<8x32xf32>
    %133 = arith.mulf %128, %132 : vector<8x32xf32>
    %134 = vector.broadcast %114 : vector<1x32xf32> to vector<8x32xf32>
    %135 = arith.mulf %133, %134 : vector<8x32xf32>
    %136 = vector.broadcast %115 : vector<1x32xf32> to vector<8x32xf32>
    %137 = arith.addf %135, %136 : vector<8x32xf32>
    %138 = arith.truncf %137 : vector<8x32xf32> to vector<8x32xbf16>
    %c0_38 = arith.constant 0 : index
    %c0_39 = arith.constant 0 : index
    %c0_40 = arith.constant 0 : index
    %139 = vector.load %arg6[%c0_38, %c0_39, %c0_40] : memref<1x32x64xbf16, #tpu.memory_space<vmem>>, vector<1x32x64xbf16>
    %140 = vector.shape_cast %139 : vector<1x32x64xbf16> to vector<32x64xbf16>
    %cst_41 = arith.constant dense<0.000000e+00> : vector<8x64xf32>
    %141 = tpu.matmul %138, %140, %cst_41 {dimension_numbers = #tpu.dot_dimension_numbers<[1], [0], [0], [1], [0, 0, 1, 1], [], []>} : vector<8x32xbf16>, vector<32x64xbf16>, vector<8x64xf32> -> vector<8x64xf32>
    %c0_42 = arith.constant 0 : index
    %c0_43 = arith.constant 0 : index
    %c0_44 = arith.constant 0 : index
    %142 = vector.load %arg10[%c0_42, %c0_43, %c0_44] : memref<1x1x64xf32, #tpu.memory_space<vmem>>, vector<1x1x64xf32>
    %143 = vector.shape_cast %142 : vector<1x1x64xf32> to vector<1x64xf32>
    %144 = vector.broadcast %143 : vector<1x64xf32> to vector<8x64xf32>
    %145 = arith.addf %141, %144 : vector<8x64xf32>
    %cst_45 = arith.constant 0.000000e+00 : f32
    %146 = vector.broadcast %cst_45 : f32 to vector<8x64xf32>
    %147 = arith.maximumf %145, %146 : vector<8x64xf32>
    %148 = arith.truncf %147 : vector<8x64xf32> to vector<8x64xbf16>
    %c0_46 = arith.constant 0 : index
    %c0_47 = arith.constant 0 : index
    %c0_48 = arith.constant 0 : index
    %149 = vector.load %arg7[%c0_46, %c0_47, %c0_48] : memref<1x64x32xbf16, #tpu.memory_space<vmem>>, vector<1x64x32xbf16>
    %150 = vector.shape_cast %149 : vector<1x64x32xbf16> to vector<64x32xbf16>
    %cst_49 = arith.constant dense<0.000000e+00> : vector<8x32xf32>
    %151 = tpu.matmul %148, %150, %cst_49 {dimension_numbers = #tpu.dot_dimension_numbers<[1], [0], [0], [1], [0, 0, 1, 1], [], []>} : vector<8x64xbf16>, vector<64x32xbf16>, vector<8x32xf32> -> vector<8x32xf32>
    %152 = vector.extract_strided_slice %8 {offsets = [1, 0], sizes = [1, 32], strides = [1, 1]} : vector<2x32xf32> to vector<1x32xf32>
    %153 = vector.broadcast %152 : vector<1x32xf32> to vector<8x32xf32>
    %154 = arith.addf %151, %153 : vector<8x32xf32>
    %155 = arith.addf %154, %113 : vector<8x32xf32>
    %c1_i32 = arith.constant 1 : i32
    %156 = arith.cmpi slt, %arg1, %c1_i32 : i32
    %157 = arith.extui %156 : i1 to i32
    %c0_i32_50 = arith.constant 0 : i32
    %158 = arith.cmpi ne, %157, %c0_i32_50 : i32
    scf.if %158 {
      %162 = vector.shape_cast %155 : vector<8x32xf32> to vector<1x8x32xf32>
      %c0_53 = arith.constant 0 : index
      %c0_54 = arith.constant 0 : index
      %c0_55 = arith.constant 0 : index
      %163 = vector.load %arg13[%c0_53, %c0_54, %c0_55] : memref<1x8x32xf32, #tpu.memory_space<vmem>>, vector<1x8x32xf32>
      tpu.vector_store %arg13[%c0_53, %c0_54, %c0_55], %162 {strides = array<i32>} : memref<1x8x32xf32, #tpu.memory_space<vmem>>, vector<1x8x32xf32>,
    } else {
    }
    %c1_i32_51 = arith.constant 1 : i32
    %159 = arith.cmpi eq, %arg1, %c1_i32_51 : i32
    %160 = arith.extui %159 : i1 to i32
    %c0_i32_52 = arith.constant 0 : i32
    %161 = arith.cmpi ne, %160, %c0_i32_52 : i32
    scf.if %161 {
      %c0_53 = arith.constant 0 : index
      %c0_54 = arith.constant 0 : index
      %162 = vector.load %arg12[%c0_53, %c0_54] : memref<2x32xf32, #tpu.memory_space<vmem>>, vector<2x32xf32>
      %163 = vector.extract_strided_slice %162 {offsets = [0, 0], sizes = [1, 32], strides = [1, 1]} : vector<2x32xf32> to vector<1x32xf32>
      %164 = vector.extract_strided_slice %162 {offsets = [1, 0], sizes = [1, 32], strides = [1, 1]} : vector<2x32xf32> to vector<1x32xf32>
      %cst_55 = arith.constant dense<0.000000e+00> : vector<8xf32>
      %165 = vector.multi_reduction <add>, %155, %cst_55 [1] : vector<8x32xf32> to vector<8xf32>
      %166 = vector.shape_cast %165 : vector<8xf32> to vector<8x1xf32>
      %cst_56 = arith.constant 3.200000e+01 : f32
      %167 = vector.broadcast %cst_56 : f32 to vector<8x1xf32>
      %168 = arith.divf %166, %167 : vector<8x1xf32>
      %169 = vector.broadcast %168 : vector<8x1xf32> to vector<8x32xf32>
      %170 = arith.subf %155, %169 : vector<8x32xf32>
      %171 = arith.mulf %170, %170 : vector<8x32xf32>
      %cst_57 = arith.constant dense<0.000000e+00> : vector<8xf32>
      %172 = vector.multi_reduction <add>, %171, %cst_57 [1] : vector<8x32xf32> to vector<8xf32>
      %173 = vector.shape_cast %172 : vector<8xf32> to vector<8x1xf32>
      %cst_58 = arith.constant 3.200000e+01 : f32
      %174 = vector.broadcast %cst_58 : f32 to vector<8x1xf32>
      %175 = arith.divf %173, %174 : vector<8x1xf32>
      %176 = vector.broadcast %168 : vector<8x1xf32> to vector<8x32xf32>
      %177 = arith.subf %155, %176 : vector<8x32xf32>
      %cst_59 = arith.constant 9.99999997E-7 : f32
      %178 = vector.broadcast %cst_59 : f32 to vector<8x1xf32>
      %179 = arith.addf %175, %178 : vector<8x1xf32>
      %180 = math.rsqrt %179 : vector<8x1xf32>
      %181 = vector.broadcast %180 : vector<8x1xf32> to vector<8x32xf32>
      %182 = arith.mulf %177, %181 : vector<8x32xf32>
      %183 = vector.broadcast %163 : vector<1x32xf32> to vector<8x32xf32>
      %184 = arith.mulf %182, %183 : vector<8x32xf32>
      %185 = vector.broadcast %164 : vector<1x32xf32> to vector<8x32xf32>
      %186 = arith.addf %184, %185 : vector<8x32xf32>
      %187 = vector.shape_cast %186 : vector<8x32xf32> to vector<1x8x32xf32>
      %c0_60 = arith.constant 0 : index
      %c0_61 = arith.constant 0 : index
      %c0_62 = arith.constant 0 : index
      %188 = vector.load %arg13[%c0_60, %c0_61, %c0_62] : memref<1x8x32xf32, #tpu.memory_space<vmem>>, vector<1x8x32xf32>
      tpu.vector_store %arg13[%c0_60, %c0_61, %c0_62], %187 {strides = array<i32>} : memref<1x8x32xf32, #tpu.memory_space<vmem>>, vector<1x8x32xf32>,
    } else {
    }
    return
  }
  func.func @transform_0(%arg0: i32, %arg1: i32) -> (i32, i32, i32) {
    %c0_i32 = arith.constant 0 : i32
    %c0_i32_0 = arith.constant 0 : i32
    %c0_i32_1 = arith.constant 0 : i32
    return %arg0, %c0_i32, %c0_i32_0 : i32, i32, i32
  }
  func.func @transform_1(%arg0: i32, %arg1: i32) -> (i32, i32, i32) {
    %c0_i32 = arith.constant 0 : i32
    %c0_i32_0 = arith.constant 0 : i32
    %c0_i32_1 = arith.constant 0 : i32
    return %arg0, %c0_i32, %c0_i32_0 : i32, i32, i32
  }
  func.func @transform_2(%arg0: i32, %arg1: i32) -> (i32, i32, i32) {
    %c0_i32 = arith.constant 0 : i32
    %c0_i32_0 = arith.constant 0 : i32
    %c0_i32_1 = arith.constant 0 : i32
    return %arg1, %c0_i32, %c0_i32_0 : i32, i32, i32
  }
  func.func @transform_3(%arg0: i32, %arg1: i32) -> (i32, i32, i32) {
    %c0_i32 = arith.constant 0 : i32
    %c0_i32_0 = arith.constant 0 : i32
    %c0_i32_1 = arith.constant 0 : i32
    return %arg1, %c0_i32, %c0_i32_0 : i32, i32, i32
  }
  func.func @transform_4(%arg0: i32, %arg1: i32) -> (i32, i32, i32) {
    %c0_i32 = arith.constant 0 : i32
    %c0_i32_0 = arith.constant 0 : i32
    %c0_i32_1 = arith.constant 0 : i32
    return %arg1, %c0_i32, %c0_i32_0 : i32, i32, i32
  }
  func.func @transform_5(%arg0: i32, %arg1: i32) -> (i32, i32, i32) {
    %c0_i32 = arith.constant 0 : i32
    %c0_i32_0 = arith.constant 0 : i32
    %c0_i32_1 = arith.constant 0 : i32
    return %arg1, %c0_i32, %c0_i32_0 : i32, i32, i32
  }
  func.func @transform_6(%arg0: i32, %arg1: i32) -> (i32, i32, i32) {
    %c0_i32 = arith.constant 0 : i32
    %c0_i32_0 = arith.constant 0 : i32
    %c0_i32_1 = arith.constant 0 : i32
    return %arg1, %c0_i32, %c0_i32_0 : i32, i32, i32
  }
  func.func @transform_7(%arg0: i32, %arg1: i32) -> (i32, i32, i32) {
    %c0_i32 = arith.constant 0 : i32
    %c0_i32_0 = arith.constant 0 : i32
    %c0_i32_1 = arith.constant 0 : i32
    return %arg1, %c0_i32, %c0_i32_0 : i32, i32, i32
  }
  func.func @transform_8(%arg0: i32, %arg1: i32) -> (i32, i32, i32) {
    %c0_i32 = arith.constant 0 : i32
    %c0_i32_0 = arith.constant 0 : i32
    %c0_i32_1 = arith.constant 0 : i32
    return %arg1, %c0_i32, %c0_i32_0 : i32, i32, i32
  }
  func.func @transform_9(%arg0: i32, %arg1: i32) -> (i32, i32, i32) {
    %c0_i32 = arith.constant 0 : i32
    %c0_i32_0 = arith.constant 0 : i32
    %c0_i32_1 = arith.constant 0 : i32
    return %arg1, %c0_i32, %c0_i32_0 : i32, i32, i32
  }
  func.func @transform_10(%arg0: i32, %arg1: i32) -> (i32, i32) {
    %c0_i32 = arith.constant 0 : i32
    %c0_i32_0 = arith.constant 0 : i32
    %c0_i32_1 = arith.constant 0 : i32
    return %c0_i32, %c0_i32_0 : i32, i32
  }
  func.func @transform_11(%arg0: i32, %arg1: i32) -> (i32, i32, i32) {
    %c0_i32 = arith.constant 0 : i32
    %c0_i32_0 = arith.constant 0 : i32
    %c0_i32_1 = arith.constant 0 : i32
    return %arg0, %c0_i32, %c0_i32_0 : i32, i32, i32
  }
}

</mosaic_0001>

<bundles_post_ra>
// kernel: tpu_custom_call.1
= control target key start
LH: loop header
LB: loop body
LE: loop exit
PB: predicated region body
PF: predicated region fallthrough
CT: control target
= control target key end

     0   :  { %s2522_s0 = inlined_call_operand.hbm [shape: f32[2,8,32], index: 0, kind: input, shape index: {}]   ;;  %s2523_s1 = inlined_call_operand.vmem [shape: f32[2,1,8], index: 1, kind: input, shape index: {}]   ;;  %s2524_s2 = inlined_call_operand.vmem [shape: bf16[2,32,96], index: 2, kind: input, shape index: {}]   ;;  %s2525_s3 = inlined_call_operand.vmem [shape: bf16[2,32,32], index: 3, kind: input, shape index: {}]   ;;  %s2526_s4 = inlined_call_operand.vmem [shape: bf16[2,32,64], index: 4, kind: input, shape index: {}]   ;;  %s2527_s5 = inlined_call_operand.vmem [shape: bf16[2,64,32], index: 5, kind: input, shape index: {}]   ;;  %s2528_s6 = inlined_call_operand.vmem [shape: f32[2,4,32], index: 6, kind: input, shape index: {}]   ;;  %s2529_s7 = inlined_call_operand.vmem [shape: f32[2,1,96], index: 7, kind: input, shape index: {}]   ;;  %s2530_s8 = inlined_call_operand.vmem [shape: f32[2,1,64], index: 8, kind: input, shape index: {}]   ;;  %s2531_s9 = inlined_call_operand.vmem [shape: f32[2,2,32], index: 9, kind: input, shape index: {}]   ;;  %s2532_s10 = inlined_call_operand.vmem [shape: f32[2,32], index: 10, kind: input, shape index: {}]   ;;  %s2533_s11 = inlined_call_operand.hbm [shape: f32[2,8,32], index: 11, kind: output, shape index: {}]  }
   0x1   :  { %2549 = sst [smem:[#allocation21_spill]] %s2522_s0 }
   0x2   :  { %2550 = sst [smem:[#allocation22_spill]] %s2524_s2 }
   0x3   :  { %2551 = sst [smem:[#allocation23_spill]] %s2525_s3 }
   0x4   :  { %2552 = sst [smem:[#allocation24_spill]] %s2526_s4 }
   0x5   :  { %2553 = sst [smem:[#allocation25_spill]] %s2532_s10 }
   0x6   :  { %2554 = sst [smem:[#allocation26_spill]] %s2533_s11 }
   0x7   :  { %16 = vsyncpa [#allocation3], 0 }
   0x8   :  { %18 = vsyncpa [#allocation3 + $0x1], 0 }
   0x9   :  { %19 = vsyncpa [#allocation4], 0 }
   0xa   :  { %21 = vsyncpa [#allocation4 + $0x1], 0  ;;  %s2118_s17 = smov 0   ;;  %s2120_s18 = smov 0  }
   0xb   :  { %s2122_s19 = smov 0   ;;  %s2124_s20 = smov 0  }
   0xc   :  { %s2126_s21 = smov 0   ;;  %s2128_s22 = smov 0  }
   0xd   :  { %s2130_s23 = smov 0   ;;  %s2132_s24 = smov 0  }
   0xe LB: > { %2555 = sst [smem:[#allocation8_spill]] %s2016_s17  ;;  %s1628_s25 = sadd.s32 4294967295, %s2044_s24   ;;  %s2044_s24 = sphi %s2132_s24, %s27_s24   ;;  %s2040_s23 = sphi %s2130_s23, %s2596_s23   ;;  %s2036_s22 = sphi %s2128_s22, %s2595_s22   ;;  %s2032_s21 = sphi %s2126_s21, %s2594_s21   ;;  %s2028_s20 = sphi %s2124_s20, %s2593_s20   ;;  %s2024_s19 = sphi %s2122_s19, %s2592_s19   ;;  %s2020_s18 = sphi %s2120_s18, %s2591_s18   ;;  %s2016_s17 = sphi %s2118_s17, %s2590_s17  }
   0xf   : > { %2556 = sst [smem:[#allocation9_spill]] %s2020_s18  ;;  %s1629_s26 = sadd.s32 4294967294, %s2044_s24  }
  0x10   : > { %2557 = sst [smem:[#allocation10_spill]] %s2024_s19  ;;  %s36_s27 = sadd.s32 1, %s2036_s22 }
  0x11   : > { %2558 = sst [smem:[#allocation11_spill]] %s2032_s21  ;;  %s39_s28 = sadd.s32 1, %s2040_s23 }
  0x12   : > { %2559 = sst [smem:[#allocation12_spill]] %s2036_s22  ;;  %p37_p0 = scmp.ge.s32.totalorder %s36_s27, 2 }
  0x13   : > { %2560 = sst [smem:[#allocation13_spill]] %s2040_s23  ;;  %s46_s29 = sadd.s32 1, %s2024_s19 }
  0x14   : > { %2561 = sst [smem:[#allocation14_spill]] %s2044_s24  ;;  %p53_p1 = scmp.ne.s32.totalorder %s2024_s19, %s2020_s18 }
  0x15   : > { %p54_p2 = scmp.eq.s32.totalorder %s2044_s24, 0  ;;  %s2598_s27 = smov (%p37_p0, %s36_s27), 0 }
  0x16   : > { %2562 = sst [smem:[#allocation15_spill]] %s2598_s27  ;;  %s2600_s28 = smov (!%p37_p0, %s39_s28), %s2040_s23 }
  0x17   : > { %p2169_p3 = por %p54_p2, %p53_p1  ;;  %p59_p4 = scmp.ne.s32.totalorder %s2020_s18, %s2016_s17 }
  0x18   : > { %p41_p5 = scmp.ge.s32.totalorder %s2600_s28, 2  ;;  %p60_p6 = scmp.eq.s32.totalorder %s1628_s25, 0 }
  0x19   : > { %p338_p7 = scmp.eq.s32.totalorder %s1628_s25, 3  ;;  %p344_p8 = scmp.eq.s32.totalorder %s1629_s26, 3 }
  0x1a   : > { %s2602_s28 = smov (%p41_p5, %s2600_s28), 0  ;;  %p2177_p9 = por %p60_p6, %p59_p4 }
  0x1b   : > { %2564 = sst [smem:[#allocation16_spill]] %s2602_s28  ;;  %p2181_p10 = por %p338_p7, %p53_p1 }
  0x1c   : > { %s43_s14 = ssub.s32 %s2040_s23, %s2602_s28  ;;  %p2187_p11 = por %p344_p8, %p59_p4 }
  0x1d   : > { %s2566_s13 = scalar_select %p2181_p10, 1, 0 }
  0x1e   : > { %s2568_s15 = scalar_select %p2187_p11, 1, 0 }
  0x1f   : > { %2567 = sst [smem:[#allocation17_spill]] %s2566_s13  ;;  %p44_p12 = scmp.eq.s32.totalorder %s43_s14, 0 }
  0x20   : > { %2569 = sst [smem:[#allocation18_spill]] %s2568_s15  ;;  %p1808_p13 = scmp.lt.s32.totalorder %s2044_s24, 4 }
  0x21   : > { %s367_s16 = sand.u32 1, %s2024_s19   ;;  %s1633_s27 = sshll.u32 %s2040_s23, 7 }
  0x22   : > { %s2194_s25 = scalar_select %p44_p12, %s2024_s19, %s46_s29  }
  0x23   : > { %s1632_s26 = sshll.u32 %s367_s16, 3  ;;  %s2571_s0 = sld [smem:[#allocation21_spill]] }
  0x24   : > { %2570 = sst [smem:[#allocation19_spill]] %s2194_s25  ;;  %s371_s28 = scalar_lea.vmem [#allocation2], %s1632_s26 }
  0x25   : > { %s378_s13 = sshll.u32 %s371_s28, 4  ;;  %p2206_p0 = pnand %p1808_p13, %p2169_p3  ;;  %s2202_s13 = int_to_ptr.vmem [resolvable:$true] %s378_s13 }
  0x26   : > { %s368_s17 = scalar_lea.sflag [#allocation3], %s367_s16 }
  0x27   : > { %p1918_p5 = pneg %p2206_p0 }
  0x29   : > { %s2200_s11 = scalar_lea.hbm %s2571_s0, %s1633_s27  ;;  %s1921_s29 = scalar_lea.hbm %s2571_s0, 256 }
  0x2a   : > { %s1916_s22 = scalar_lea.hbm %s2200_s11, 128  ;;  %p1922_p3 = scmp.lt.u32.totalorder %s2200_s11, %s2571_s0 }
  0x2b   : > { %p1917_p4 = scmp.ne.s32.totalorder %s2200_s11, %s1916_s22  ;;  %p1923_p8 = scmp.lt.u32.totalorder %s1921_s29, %s1916_s22 }
  0x2c   : > { %p1925_p13 = scmp.lt.u32.totalorder %s1916_s22, %s2200_s11 }
  0x2d   : > { %p1919_p6 = pnand %p1918_p5, %p1917_p4  ;;  %p1924_p12 = por %p1923_p8, %p1922_p3 }
  0x2f   : > { %p1920_p7 = pneg %p1919_p6  ;;  %p1926_p1 = por %p1925_p13, %p1924_p12 }
  0x31   : > { %p1927_p2 = pnand %p1926_p1, %p1920_p7 }
  0x33   : > { %1930 = shalt.err (!%p1927_p2)
}
  0x34   : > { %s1931_s16 = scalar_lea.vmem %s2202_s13, 128  ;;  %s2046_s27 = smov [#allocation2]  }
  0x35   : > { %p1932_p4 = scmp.ne.s32.totalorder %s2202_s13, %s1931_s16  ;;  %s1936_s28 = sshll.u32 %s2046_s27, 4  ;;  %s1937_s28 = int_to_ptr.vmem [resolvable:$false] %s1936_s28 }
  0x36   : > { %s1938_s30 = scalar_lea.vmem %s1937_s28, 256  ;;  %p1939_p10 = scmp.lt.s32.totalorder %s2202_s13, %s1937_s28 }
  0x37   : > { %p1934_p6 = pnand %p1932_p4, %p1918_p5  ;;  %p1940_p3 = scmp.lt.s32.totalorder %s1938_s30, %s1931_s16 }
  0x39   : > { %p1935_p11 = pneg %p1934_p6  ;;  %p1941_p8 = por %p1940_p3, %p1939_p10 }
  0x3b   : > { %p1942_p12 = pnand %p1941_p8, %p1935_p11 }
  0x3d   : > { %1945 = shalt.err (!%p1942_p12)
}
  0x3e   : > { %1803 = dma.hbm_to_vmem [thread:$0]  (!%p2206_p0), %s2200_s11, 128, %s2202_s13, %s368_s17  }
  0x3f   : > { %p2573_p1 = scmp.lt.s32.totalorder %s2044_s24, 5  ;;  %p2574_p2 = scmp.ge.s32.totalorder %s2044_s24, 1 }
  0x41   : > { %p448_p5 = pnand %p2574_p2, %p2573_p1 }
  0x43   : > { %451 = sbr.rel (%p448_p5) target bundleno = 3044 (0xbe4), region = 64 }
  0x4a   : > { %s2242_s22 = sand.u32 1, %s2020_s18  }
  0x4b   : > { %2575 = sst [smem:[#allocation20_spill]] %s2242_s22  ;;  %s1635_s29 = sshll.u32 %s2242_s22, 3 }
  0x4c   : > { %s454_s26 = scalar_lea.sflag [#allocation3], %s2242_s22  ;;  %s457_s16 = scalar_lea.vmem [#allocation2], %s1635_s29 }
  0x4d   : > { %2007 = dma.done.wait (%p2177_p9), %s454_s26, 128  }
  0x4e   : > { %2009 = vsyncadd (%p2177_p9), %s454_s26, 4294967168  ;;  %p533_p10 = scmp.lt.s32.totalorder %s2032_s21, 1  ;;  %p536_p11 = scmp.lt.s32.totalorder %s2028_s20, 1 }
  0x4f   : > { %s2576_s2 = sld [smem:[#allocation22_spill]]  ;;  %s2577_s3 = sld [smem:[#allocation23_spill]] }
  0x50   : > { %s2253_s11 = scalar_select %p533_p10, %s2032_s21, 1 }
  0x51   : > { %s2256_s13 = scalar_select %p536_p11, %s2028_s20, 1 }
  0x52   : > { %s2578_s4 = sld [smem:[#allocation24_spill]]  ;;  %s2304_s15 = scalar_lea.vmem [#allocation5], %s1635_s29 }
  0x53   : > { %s1678_s27 = sshll.u32 %s2256_s13, 4  ;;  %s1681_s28 = sshll.u32 %s2256_s13, 5 }
  0x54   : > { %s2282_s12 = scalar_lea.vmem %s2527_s5, %s1681_s28  ;;  %s1645_s22 = sshll.u32 %s2256_s13, 2 }
  0x55   : > { %s2267_s0 = scalar_lea.vmem %s2576_s2, %s1678_s27  ;;  %s2272_s19 = scalar_lea.vmem %s2577_s3, %s1678_s27 }
  0x56   : > { %s562_s26 = scalar_lea.vmem %s2529_s7, %s2256_s13  ;;  %s2292_s23 = scalar_lea.vmem %s2528_s6, %s1645_s22 }
  0x57   : > { %s1646_s14 = sshll.u32 %s2256_s13, 1  ;;  %p1647_p9 = scmp.ne.s32.totalorder %s2028_s20, 0 }
  0x58   : > { %s2277_s18 = scalar_lea.vmem %s2578_s4, %s1678_s27  ;;  %s565_s27 = scalar_lea.vmem %s2530_s8, %s2256_s13  ;;  %v575_v0 = vld [vmem:[%s457_s16] sm:$0xff] (!%p1647_p9)  ;;  %vm576_vm0 = vcmask (!%p1647_p9), 261120  }
  0x59   : > { %s2302_s24 = scalar_lea.vmem %s2531_s9, %s1646_s14  ;;  %574 = sbr.rel (%p1647_p9) target bundleno = 96 (0x60), region = 72  ;;  %577 = vst.msk [vmem:[%s2304_s15] sm:$0xff] (!%p1647_p9), %vm576_vm0, %v575_v0 }
  0x60 PF: > { %v2309_v1 = vld [vmem:[%s2304_s15] sm:$0xff]  ;;  %vm581_vm1 = vcmask 261120   ;;  %v1884_v8 = vld [vmem:[%s2267_s0] sm:$0xff]   ;;  %v2047_v9 = vmov 0.0   ;;  %vm2048_vm2 = vmmov 0   ;;  %v1885_v10 = vld [vmem:[%s2267_s0 + $0x8] sm:$0xff]   ;;  %v596_v13 = vlaneseq  ;;  %s2579_s16 = scalar_lea.vmem %s2523_s1, %s2253_s11 }
  0x61   : > { %v582_v2 = vsel %vm581_vm1, %v2309_v1, 0.0  ;;  %1712 = vmatprep.subr.bf16.mxu0 %v2047_v9  ;;  %1716 = vmatprep.mubr.msk.bf16.mxu0 %vm2048_vm2, %v2047_v9  ;;  %v2331_v17 = vld [vmem:[%s2292_s23] sm:$0xf]  ;;  %s2049_s3 = smov 104   ;;  %s2050_s4 = smov 120   ;;  %vm698_vm3 = vcmask 64512  }
  0x62   : > { %583 = vadd.xlane.f32.xlu0 %v582_v2  ;;  %1713 = vmatpush3.bf16.msra.mxu0 %v1884_v8  ;;  %v2325_v15 = vshrl.u32 %v596_v13, 7  ;;  %v1648_v26 = vld [vmem:[%s562_s26] ss:$0 sm:$0xff]  ;;  %s2051_s10 = smov 112   ;;  %s2052_s21 = smov 96   ;;  %vm957_vm4 = vcmask 1043456  }
  0x63   : > { %1720 = vmatprep.subr.bf16.mxu1 %v2047_v9  ;;  %1714 = vmatprep.subr.bf16.mxu0 %v2047_v9  ;;  %v892_v55 = vld [vmem:[%s2579_s16] sm:$0x1]  ;;  %s2053_s11 = smov 64   ;;  %s2054_s28 = smov 8   ;;  %vm1158_vm5 = vcmask 130048   ;;  %vm1160_vm6 = vcmask 195584  }
  0x64   : > { %1722 = vmatprep.mubr.msk.bf16.mxu1 %vm2048_vm2, %v2047_v9  ;;  %v2328_v16 = vsub.s32 0, %v2325_v15  ;;  %v2334_v18 = vsub.s32 1, %v2325_v15  ;;  %v893_v56 = vmul.f32 -1e+18, %v892_v55  ;;  %s2055_s30 = smov 16   ;;  %s2056_s26 = smov 24  }
  0x65   : > { %vm1355_vm7 = vcmask 523264   ;;  %p1672_p0 = scmp.ge.s32.totalorder %s2028_s20, 1 }
  0x66   : > { %1715 = vmatpush3.bf16.msra.mxu0 %v1885_v10  ;;  %v599_v19 = vrot.slane %v2331_v17, %v2328_v16  ;;  %v604_v22 = vrot.slane %v2331_v17, %v2334_v18  ;;  %v898_v57 = vrot.slane %v893_v56, %v2328_v16 }
  0x67   : > { %1726 = vmatprep.subr.bf16.mxu0 %v2047_v9 }
  0xef   : > { %v584_v3 = vpop.xlane.xlu0 %583 }
  0xf0   : > { %v586_v4 = vmul.f32 0.03125, %v584_v3 }
  0xf2   : > { %v587_v5 = vsub.f32 %v2309_v1, %v586_v4 }
  0xf4   : > { %v588_v6 = vmul.f32 %v587_v5, %v587_v5 }
  0xf6   : > { %v589_v7 = vsel %vm581_vm1, %v588_v6, 0.0 }
  0xf7   : > { %590 = vadd.xlane.f32.xlu0 %v589_v7 }
 0x184   : > { %v591_v11 = vpop.xlane.xlu0 %590 }
 0x185   : > { %v592_v12 = vmul.f32 0.03125, %v591_v11 }
 0x187   : > { %v593_v14 = vadd.f32 1e-06, %v592_v12 }
 0x189   : > { %1894 = vrsqrt.f32 %v593_v14 }
 0x193   : > { %v1895_v20 = vpop.eup %1894 }
 0x194   : > { %v595_v21 = vmul.f32 %v1895_v20, %v587_v5 }
 0x196   : > { %v600_v23 = vmul.f32 %v599_v19, %v595_v21 }
 0x198   : > { %v605_v24 = vadd.f32 %v604_v22, %v600_v23 }
 0x19a   : > { %v606_v25 = vpack.c.bf16 %v605_v24, %v605_v24 }
 0x19c   : > { %1717 = vmatmul.mubr.msk.bf16.vlgmr.msra.gmra.mrb[0].mxu0 %vm581_vm1, %v606_v25 }
 0x19d   : > { %1728 = vmatprep.mubr.msk.bf16.mxu0 %vm2048_vm2, %v2047_v9 }
 0x26f   : > { %v667_v27 = vpop.f32.mrb[0].mxu0 }
 0x270   : > { %v668_v28 = vadd.f32 %v1648_v26, %v667_v27  ;;  %v1718_v29 = vpop.f32.mrb[1].mxu0 }
 0x271   : > { %v670_v30 = vpop.f32.mrb[2].mxu0 }
 0x272   : > { %680 = vrot.lane.b32.xlu0 %v668_v28, %s2049_s3  ;;  %674 = vrot.lane.b32.xlu1 %v668_v28, %s2050_s4  ;;  %v1719_v31 = vpop.f32.mrb[3].mxu0  ;;  %v2348_v32 = vpack.c.bf16 %v668_v28, %v668_v28  ;;  %v683_v41 = vmul.f32 0.35355338, %v668_v28 }
 0x274   : > { %v687_v42 = vpack.c.bf16 %v683_v41, %v683_v41 }
 0x276   : > { %677 = vrot.lane.b32.xlu1 %v668_v28, %s2051_s10 }
 0x27a   : > { %696 = vrot.lane.b32.xlu1 %v2348_v32, %s2052_s21 }
 0x2e4   : > { %v675_v33 = vpop.permute.xlu1 %674  ;;  %v681_v37 = vpop.permute.xlu0 %680 }
 0x2e5   : > { %v2351_v34 = vpack.c.bf16 %v675_v33, %v675_v33  ;;  %v2357_v39 = vpack.c.bf16 %v681_v37, %v681_v37  ;;  %v684_v45 = vmul.f32 0.35355338, %v675_v33  ;;  %v686_v52 = vmul.f32 0.35355338, %v681_v37 }
 0x2e7   : > { %746 = vrot.lane.b32.xlu1 %v2351_v34, %s2052_s21  ;;  %v688_v48 = vpack.c.bf16 %v684_v45, %v684_v45  ;;  %v690_v54 = vpack.c.bf16 %v686_v52, %v686_v52 }
 0x2e8   : > { %v678_v35 = vpop.permute.xlu1 %677 }
 0x2e9   : > { %v2354_v36 = vpack.c.bf16 %v678_v35, %v678_v35  ;;  %v685_v49 = vmul.f32 0.35355338, %v678_v35 }
 0x2eb   : > { %795 = vrot.lane.b32.xlu1 %v2354_v36, %s2052_s21  ;;  %v689_v53 = vpack.c.bf16 %v685_v49, %v685_v49 }
 0x2ec   : > { %v697_v38 = vpop.permute.xlu1 %696 }
 0x2ed   : > { %v703_v40 = vsel %vm698_vm3, %v697_v38, 0 }
 0x2ee   : > { %1721 = vmatpush3.bf16.xpose.msra.mxu1 %v703_v40 }
 0x2ef   : > { %844 = vrot.lane.b32.xlu1 %v2357_v39, %s2052_s21  ;;  %1732 = vmatprep.subr.bf16.mxu1 %v2047_v9 }
 0x2f5   : > { %1723 = vmatmul.mubr.msk.bf16.vlgmr.msra.gmra.mrb[0].mxu1 %vm698_vm3, %v687_v42 }
 0x2f6   : > { %1734 = vmatprep.mubr.msk.bf16.mxu1 %vm2048_vm2, %v2047_v9 }
 0x359   : > { %v747_v43 = vpop.permute.xlu1 %746 }
 0x35a   : > { %v752_v44 = vsel %vm698_vm3, %v747_v43, 0 }
 0x35b   : > { %1727 = vmatpush3.bf16.xpose.msra.mxu0 %v752_v44 }
 0x35c   : > { %1738 = vmatprep.subr.bf16.mxu0 %v2047_v9 }
 0x35d   : > { %v796_v46 = vpop.permute.xlu1 %795 }
 0x35e   : > { %v801_v47 = vsel %vm698_vm3, %v796_v46, 0 }
 0x35f   : > { %1733 = vmatpush3.bf16.xpose.msra.mxu1 %v801_v47 }
 0x360   : > { %1744 = vmatprep.subr.bf16.mxu1 %v2047_v9 }
 0x361   : > { %v845_v50 = vpop.permute.xlu1 %844 }
 0x362   : > { %v850_v51 = vsel %vm698_vm3, %v845_v50, 0  ;;  %1729 = vmatmul.mubr.msk.bf16.vlgmr.msra.gmra.mrb[4].mxu0 %vm698_vm3, %v688_v48 }
 0x363   : > { %1739 = vmatpush3.bf16.xpose.msra.mxu0 %v850_v51  ;;  %1740 = vmatprep.mubr.msk.bf16.mxu0 %vm2048_vm2, %v2047_v9 }
 0x364   : > { %1750 = vmatprep.subr.bf16.mxu0 %v2047_v9 }
 0x366   : > { %1735 = vmatmul.mubr.msk.bf16.vlgmr.msra.gmra.mrb[4].mxu1 %vm698_vm3, %v689_v53 }
 0x367   : > { %1746 = vmatprep.mubr.msk.bf16.mxu1 %vm2048_vm2, %v2047_v9 }
 0x36a   : > { %1741 = vmatmul.mubr.msk.bf16.vlgmr.msra.gmra.mrb[8].mxu0 %vm698_vm3, %v690_v54 }
 0x36b   : > { %1752 = vmatprep.mubr.msk.bf16.mxu0 %vm2048_vm2, %v2047_v9 }
 0x3c8   : > { %v739_v58 = vpop.f32.mrb[0].mxu1 }
 0x3c9   : > { %v900_v59 = vadd.f32 %v898_v57, %v739_v58  ;;  %v1724_v60 = vpop.f32.mrb[1].mxu1 }
 0x3ca   : > { %v742_v61 = vpop.f32.mrb[2].mxu1 }
 0x3cb   : > { %v1725_v62 = vpop.f32.mrb[3].mxu1  ;;  %v904_v63 = vsel %vm698_vm3, %v900_v59, -inf }
 0x3cc   : > { %905 = vmax.xlane.f32.xlu1 %v904_v63 }
 0x435   : > { %v788_v0 = vpop.f32.mrb[4].mxu0 }
 0x436   : > { %v901_v2 = vadd.f32 %v898_v57, %v788_v0  ;;  %v1730_v3 = vpop.f32.mrb[5].mxu0 }
 0x437   : > { %v791_v4 = vpop.f32.mrb[6].mxu0 }
 0x438   : > { %v1731_v5 = vpop.f32.mrb[7].mxu0  ;;  %v907_v6 = vsel %vm698_vm3, %v901_v2, -inf }
 0x439   : > { %v837_v7 = vpop.f32.mrb[4].mxu1  ;;  %908 = vmax.xlane.f32.xlu0 %v907_v6 }
 0x43a   : > { %v902_v8 = vadd.f32 %v898_v57, %v837_v7  ;;  %v1736_v10 = vpop.f32.mrb[5].mxu1 }
 0x43b   : > { %v840_v11 = vpop.f32.mrb[6].mxu1  ;;  %v1886_v10 = vld [vmem:[%s2272_s19] sm:$0xff]  }
 0x43c   : > { %v1737_v12 = vpop.f32.mrb[7].mxu1  ;;  %v910_v13 = vsel %vm698_vm3, %v902_v8, -inf  ;;  %v1887_v11 = vld [vmem:[%s2272_s19 + $0x8] sm:$0xff]  }
 0x43d   : > { %911 = vmax.xlane.f32.xlu1 %v910_v13  ;;  %v886_v14 = vpop.f32.mrb[8].mxu0 }
 0x43e   : > { %v903_v19 = vadd.f32 %v898_v57, %v886_v14  ;;  %v1742_v20 = vpop.f32.mrb[9].mxu0 }
 0x43f   : > { %v889_v21 = vpop.f32.mrb[10].mxu0 }
 0x440   : > { %v1743_v22 = vpop.f32.mrb[11].mxu0  ;;  %v913_v23 = vsel %vm698_vm3, %v903_v19, -inf }
 0x441   : > { %914 = vmax.xlane.f32.xlu0 %v913_v23 }
 0x44e   : > { %952 = vrot.lane.b32.xlu1 %v2348_v32, %s2053_s11 }
 0x459   : > { %v906_v24 = vpop.xlane.xlu1 %905 }
 0x45a   : > { %v916_v25 = vsub.f32 %v900_v59, %v906_v24 }
 0x45c   : > { %v920_v26 = vmul.f32 1.442695, %v916_v25 }
 0x45e   : > { %1896 = vpow2.f32 %v920_v26 }
 0x468   : > { %v1897_v27 = vpop.eup %1896 }
 0x469   : > { %v928_v28 = vsel %vm698_vm3, %v1897_v27, 0.0 }
 0x472   : > { %929 = vadd.xlane.f32.xlu1 %v928_v28 }
 0x4c6   : > { %v909_v29 = vpop.xlane.xlu0 %908 }
 0x4c7   : > { %v917_v30 = vsub.f32 %v901_v2, %v909_v29 }
 0x4c9   : > { %v922_v31 = vmul.f32 1.442695, %v917_v30 }
 0x4ca   : > { %v912_v33 = vpop.xlane.xlu1 %911 }
 0x4cb   : > { %1898 = vpow2.f32 %v922_v31  ;;  %v918_v35 = vsub.f32 %v902_v8, %v912_v33 }
 0x4cd   : > { %v924_v37 = vmul.f32 1.442695, %v918_v35 }
 0x4ce   : > { %v953_v38 = vpop.permute.xlu1 %952  ;;  %v915_v40 = vpop.xlane.xlu0 %914 }
 0x4cf   : > { %1900 = vpow2.f32 %v924_v37  ;;  %v959_v32 = vsel %vm957_vm4, %v953_v38, 0  ;;  %v919_v41 = vsub.f32 %v903_v19, %v915_v40  ;;  %v580_v38 = vld [vmem:[%s2302_s24] sm:$0x3] }
 0x4d0   : > { %1745 = vmatpush3.bf16.msra.mxu1 %v959_v32  ;;  %v1170_v40 = vrot.slane %v580_v38, %v2328_v16 }
 0x4d1   : > { %v926_v42 = vmul.f32 1.442695, %v919_v41  ;;  %1756 = vmatprep.subr.bf16.mxu1 %v2047_v9 }
 0x4d3   : > { %1902 = vpow2.f32 %v926_v42 }
 0x4d5   : > { %v1899_v43 = vpop.eup %1898 }
 0x4d6   : > { %v931_v44 = vsel %vm698_vm3, %v1899_v43, 0.0 }
 0x4d7   : > { %932 = vadd.xlane.f32.xlu0 %v931_v44 }
 0x4d9   : > { %v1901_v45 = vpop.eup %1900 }
 0x4da   : > { %v934_v46 = vsel %vm698_vm3, %v1901_v45, 0.0 }
 0x4db   : > { %935 = vadd.xlane.f32.xlu1 %v934_v46 }
 0x4dd   : > { %v1903_v47 = vpop.eup %1902 }
 0x4de   : > { %v937_v48 = vsel %vm698_vm3, %v1903_v47, 0.0 }
 0x4df   : > { %938 = vadd.xlane.f32.xlu0 %v937_v48 }
 0x4ec   : > { %1049 = vrot.lane.b32.xlu1 %v2354_v36, %s2053_s11 }
 0x4f0   : > { %1097 = vrot.lane.b32.xlu1 %v2357_v39, %s2053_s11 }
 0x4f5   : > { %1001 = vrot.lane.b32.xlu0 %v2351_v34, %s2053_s11 }
 0x4ff   : > { %v930_v49 = vpop.xlane.xlu1 %929 }
 0x500   : > { %1904 = vrcp.f32 %v930_v49 }
 0x50a   : > { %v1905_v50 = vpop.eup %1904 }
 0x50b   : > { %v944_v51 = vmul.f32 %v1905_v50, %v1897_v27 }
 0x50d   : > { %v948_v52 = vpack.c.bf16 %v944_v51, %v944_v51 }
 0x50f   : > { %1747 = vmatmul.mubr.msk.bf16.vlgmr.msra.gmra.mrb[8].mxu1 %vm698_vm3, %v948_v52  ;;  %v1888_v52 = vld [vmem:[%s2277_s18] sm:$0xff]  }
 0x510   : > { %1758 = vmatprep.mubr.msk.bf16.mxu1 %vm2048_vm2, %v2047_v9 }
 0x564   : > { %v933_v53 = vpop.xlane.xlu0 %932 }
 0x565   : > { %1906 = vrcp.f32 %v933_v53  ;;  %v1889_v53 = vld [vmem:[%s2277_s18 + $0x8] sm:$0xff]  }
 0x568   : > { %v936_v54 = vpop.xlane.xlu1 %935 }
 0x569   : > { %1908 = vrcp.f32 %v936_v54  ;;  %v1890_v54 = vld [vmem:[%s2282_s12] sm:$0xff]  }
 0x56c   : > { %v1050_v36 = vpop.permute.xlu1 %1049  ;;  %v939_v55 = vpop.xlane.xlu0 %938 }
 0x56d   : > { %v1055_v39 = vsel %vm957_vm4, %v1050_v36, 0  ;;  %1910 = vrcp.f32 %v939_v55 }
 0x56e   : > { %1757 = vmatpush3.bf16.msra.mxu1 %v1055_v39 }
 0x56f   : > { %v1907_v34 = vpop.eup %1906  ;;  %1768 = vmatprep.subr.bf16.mxu1 %v2047_v9 }
 0x570   : > { %v945_v56 = vmul.f32 %v1907_v34, %v1899_v43  ;;  %v1002_v57 = vpop.permute.xlu0 %1001  ;;  %v1098_v59 = vpop.permute.xlu1 %1097  ;;  %v1242_v34 = vsub.s32 2, %v2325_v15 }
 0x571   : > { %v1007_v58 = vsel %vm957_vm4, %v1002_v57, 0  ;;  %v1103_v63 = vsel %vm957_vm4, %v1098_v59, 0 }
 0x572   : > { %1751 = vmatpush3.bf16.msra.mxu0 %v1007_v58  ;;  %v949_v60 = vpack.c.bf16 %v945_v56, %v945_v56  ;;  %v1247_v56 = vsub.s32 3, %v2325_v15  ;;  %v1243_v57 = vrot.slane %v2331_v17, %v1242_v34  ;;  %v1663_v15 = vld [vmem:[%s565_s27] ss:$0 sm:$0xff] }
 0x573   : > { %v1909_v61 = vpop.eup %1908  ;;  %1762 = vmatprep.subr.bf16.mxu0 %v2047_v9 }
 0x574   : > { %v946_v62 = vmul.f32 %v1909_v61, %v1901_v45 }
 0x575   : > { %1753 = vmatmul.mubr.msk.bf16.vlgmr.msra.gmra.mrb[12].mxu0 %vm698_vm3, %v949_v60  ;;  %v1248_v60 = vrot.slane %v2331_v17, %v1247_v56 }
 0x576   : > { %1763 = vmatpush3.bf16.msra.mxu0 %v1103_v63  ;;  %v950_v0 = vpack.c.bf16 %v946_v62, %v946_v62  ;;  %1764 = vmatprep.mubr.msk.bf16.mxu0 %vm2048_vm2, %v2047_v9 }
 0x577   : > { %v1911_v2 = vpop.eup %1910  ;;  %1776 = vmatprep.subr.bf16.mxu0 %v2047_v9 }
 0x578   : > { %v947_v3 = vmul.f32 %v1911_v2, %v1903_v47  ;;  %1759 = vmatmul.mubr.msk.bf16.vlgmr.msra.gmra.mrb[12].mxu1 %vm698_vm3, %v950_v0  ;;  %v1892_v0 = vld [vmem:[%s2282_s12 + $0x10] sm:$0xff]   ;;  %v1893_v2 = vld [vmem:[%s2282_s12 + $0x18] sm:$0xff]  }
 0x579   : > { %1772 = vmatprep.mubr.msk.bf16.mxu1 %vm2048_vm2, %v2047_v9  ;;  %1769 = vmatpush3.bf16.msra.mxu1 %v1886_v10  ;;  %v1330_v10 = vrot.slane %v580_v38, %v2334_v18 }
 0x57a   : > { %v951_v4 = vpack.c.bf16 %v947_v3, %v947_v3  ;;  %1770 = vmatprep.subr.bf16.mxu1 %v2047_v9 }
 0x57d   : > { %1765 = vmatmul.mubr.msk.bf16.vlgmr.msra.gmra.mrb[16].mxu0 %vm698_vm3, %v951_v4  ;;  %1771 = vmatpush3.bf16.msra.mxu1 %v1887_v11 }
 0x57e   : > { %1780 = vmatprep.mubr.msk.bf16.mxu0 %vm2048_vm2, %v2047_v9  ;;  %1784 = vmatprep.subr.bf16.mxu1 %v2047_v9 }
 0x57f   : > { %1777 = vmatpush3.bf16.msra.mxu0 %v1888_v52 }
 0x580   : > { %1778 = vmatprep.subr.bf16.mxu0 %v2047_v9 }
 0x583   : > { %1779 = vmatpush3.bf16.msra.mxu0 %v1889_v53 }
 0x5e2   : > { %v995_v5 = vpop.f32.mrb[8].mxu1 }
 0x5e3   : > { %v1748_v6 = vpop.f32.mrb[9].mxu1 }
 0x5e4   : > { %v998_v7 = vpop.f32.mrb[10].mxu1 }
 0x5e5   : > { %v1749_v8 = vpop.f32.mrb[11].mxu1 }
 0x648   : > { %v1043_v12 = vpop.f32.mrb[12].mxu0 }
 0x649   : > { %1146 = vrot.lane.b32.xlu0 %v1043_v12, %s2054_s28  ;;  %v1754_v13 = vpop.f32.mrb[13].mxu0 }
 0x64a   : > { %v1046_v14 = vpop.f32.mrb[14].mxu0 }
 0x64b   : > { %v1755_v19 = vpop.f32.mrb[15].mxu0  ;;  %v1091_v20 = vpop.f32.mrb[12].mxu1 }
 0x64c   : > { %1150 = vrot.lane.b32.xlu1 %v1091_v20, %s2055_s30  ;;  %v1760_v21 = vpop.f32.mrb[13].mxu1 }
 0x64d   : > { %v1094_v22 = vpop.f32.mrb[14].mxu1 }
 0x64e   : > { %v1761_v23 = vpop.f32.mrb[15].mxu1 }
 0x650   : > { %v1139_v24 = vpop.f32.mrb[16].mxu0 }
 0x651   : > { %1154 = vrot.lane.b32.xlu0 %v1139_v24, %s2056_s26  ;;  %v1766_v25 = vpop.f32.mrb[17].mxu0 }
 0x652   : > { %v1142_v26 = vpop.f32.mrb[18].mxu0 }
 0x653   : > { %v1767_v27 = vpop.f32.mrb[19].mxu0 }
 0x6bb   : > { %v1147_v28 = vpop.permute.xlu0 %1146 }
 0x6bc   : > { %v1157_v30 = vsel %vm698_vm3, %v995_v5, %v1147_v28 }
 0x6be   : > { %v1151_v29 = vpop.permute.xlu1 %1150 }
 0x6bf   : > { %v1159_v31 = vsel %vm1158_vm5, %v1157_v30, %v1151_v29 }
 0x6c3   : > { %v1155_v33 = vpop.permute.xlu0 %1154 }
 0x6c4   : > { %v1161_v35 = vsel %vm1160_vm6, %v1159_v31, %v1155_v33 }
 0x6c5   : > { %v1162_v37 = vpack.c.bf16 %v1161_v35, %v1161_v35 }
 0x6c7   : > { %1773 = vmatmul.mubr.msk.bf16.vlgmr.msra.gmra.mrb[16].mxu1 %vm581_vm1, %v1162_v37 }
 0x6c8   : > { %1792 = vmatprep.mubr.msk.bf16.mxu1 %vm2048_vm2, %v2047_v9  ;;  %1785 = vmatpush3.bf16.msra.mxu1 %v1890_v54 }
 0x6c9   : > { %1786 = vmatprep.subr.bf16.mxu1 %v2047_v9 }
 0x79a   : > { %v1220_v32 = vpop.f32.mrb[16].mxu1 }
 0x79b   : > { %v1221_v41 = vadd.f32 %v1220_v32, %v1170_v40  ;;  %v1774_v42 = vpop.f32.mrb[17].mxu1 }
 0x79c   : > { %v1223_v43 = vpop.f32.mrb[18].mxu1 }
 0x79d   : > { %v1226_v44 = vadd.f32 %v1221_v41, %v2309_v1  ;;  %v1775_v45 = vpop.f32.mrb[19].mxu1  ;;  %v1891_v1 = vld [vmem:[%s2282_s12 + $0x8] sm:$0xff]  }
 0x79e   : > { %1787 = vmatpush3.bf16.msra.mxu1 %v1891_v1 }
 0x79f   : > { %v1227_v46 = vsel %vm581_vm1, %v1226_v44, 0.0  ;;  %1788 = vmatprep.subr.bf16.mxu1 %v2047_v9 }
 0x7a0   : > { %1228 = vadd.xlane.f32.xlu1 %v1227_v46 }
 0x7a2   : > { %1789 = vmatpush3.bf16.msra.mxu1 %v1892_v0 }
 0x7a3   : > { %1790 = vmatprep.subr.bf16.mxu1 %v2047_v9 }
 0x7a6   : > { %1791 = vmatpush3.bf16.msra.mxu1 %v1893_v2 }
 0x82d   : > { %v1229_v47 = vpop.xlane.xlu1 %1228 }
 0x82e   : > { %v1230_v48 = vmul.f32 0.03125, %v1229_v47 }
 0x830   : > { %v1231_v49 = vsub.f32 %v1226_v44, %v1230_v48 }
 0x832   : > { %v1232_v50 = vmul.f32 %v1231_v49, %v1231_v49 }
 0x834   : > { %v1233_v51 = vsel %vm581_vm1, %v1232_v50, 0.0 }
 0x835   : > { %1234 = vadd.xlane.f32.xlu0 %v1233_v51 }
 0x8c2   : > { %v1235_v36 = vpop.xlane.xlu0 %1234 }
 0x8c3   : > { %v1236_v55 = vmul.f32 0.03125, %v1235_v36 }
 0x8c5   : > { %v1237_v39 = vadd.f32 1e-06, %v1236_v55 }
 0x8c7   : > { %1912 = vrsqrt.f32 %v1237_v39 }
 0x8d1   : > { %v1913_v58 = vpop.eup %1912 }
 0x8d2   : > { %v1239_v59 = vmul.f32 %v1913_v58, %v1231_v49 }
 0x8d4   : > { %v1244_v61 = vmul.f32 %v1243_v57, %v1239_v59 }
 0x8d6   : > { %v1249_v62 = vadd.f32 %v1248_v60, %v1244_v61 }
 0x8d8   : > { %v1250_v63 = vpack.c.bf16 %v1249_v62, %v1249_v62 }
 0x8da   : > { %1781 = vmatmul.mubr.msk.bf16.vlgmr.msra.gmra.mrb[20].mxu0 %vm581_vm1, %v1250_v63 }
 0x9ad   : > { %v1311_v3 = vpop.f32.mrb[20].mxu0 }
 0x9ae   : > { %v1312_v4 = vadd.f32 %v1663_v15, %v1311_v3  ;;  %v1782_v5 = vpop.f32.mrb[21].mxu0 }
 0x9af   : > { %v1314_v17 = vpop.f32.mrb[22].mxu0 }
 0x9b0   : > { %v1317_v6 = vmax.f32 %v1312_v4, 0.0  ;;  %v1783_v7 = vpop.f32.mrb[23].mxu0 }
 0x9b2   : > { %v1318_v8 = vpack.c.bf16 %v1317_v6, %v1317_v6 }
 0x9b4   : > { %1793 = vmatmul.mubr.msk.bf16.vlgmr.msra.gmra.mrb[20].mxu1 %vm1355_vm7, %v1318_v8 }
 0xa84   : > { %1403 = sbr.rel (%p1672_p0) target bundleno = 2701 (0xa8d), region = 76 }
 0xa87   : > { %v1393_v11 = vpop.f32.mrb[20].mxu1 }
 0xa88   : > { %v1394_v9 = vadd.f32 %v1393_v11, %v1330_v10  ;;  %v1794_v12 = vpop.f32.mrb[21].mxu1 }
 0xa89   : > { %v1396_v13 = vpop.f32.mrb[22].mxu1 }
 0xa8a   : > { %v1399_v14 = vadd.f32 %v1394_v9, %v1226_v44  ;;  %v1795_v19 = vpop.f32.mrb[23].mxu1 }
 0xa8c   : > { %1404 = vst.msk [vmem:[%s2304_s15] sm:$0xff] %vm581_vm1, %v1399_v14 }
 0xa8d PF: > { %p1673_p7 = scmp.ne.s32.totalorder %s2028_s20, 1 }
 0xa8e   : > { %v1410_v20 = vsel (!%p1673_p7), %vm581_vm1, %v1399_v14, 0.0  ;;  %s2580_s23 = sld [smem:[#allocation25_spill]] (!%p1673_p7) }
 0xa8f   : > { %1408 = sbr.rel (%p1673_p7) target bundleno = 3016 (0xbc8), region = 80  ;;  %1411 = vadd.xlane.f32.xlu0 (!%p1673_p7), %v1410_v20 }
 0xa94   : > { %v1409_v29 = vld [vmem:[%s2580_s23] sm:$0x3] (!%p1673_p7) }
 0xa95   : > { %v1426_v30 = vrot.slane (!%p1673_p7), %v1409_v29, %v2328_v16  ;;  %v1431_v35 = vrot.slane (!%p1673_p7), %v1409_v29, %v2334_v18 }
 0xb1c   : > { %v1412_v21 = vpop.xlane.xlu0 %1411 }
 0xb1d   : > { %v1413_v22 = vmul.f32 0.03125, %v1412_v21 }
 0xb1f   : > { %v1414_v23 = vsub.f32 %v1399_v14, %v1413_v22 }
 0xb21   : > { %v1415_v24 = vmul.f32 %v1414_v23, %v1414_v23 }
 0xb23   : > { %v1416_v25 = vsel %vm581_vm1, %v1415_v24, 0.0 }
 0xb24   : > { %1417 = vadd.xlane.f32.xlu0 %v1416_v25 }
 0xbb1   : > { %v1418_v26 = vpop.xlane.xlu0 %1417 }
 0xbb2   : > { %v1419_v27 = vmul.f32 0.03125, %v1418_v26 }
 0xbb4   : > { %v1420_v28 = vadd.f32 1e-06, %v1419_v27 }
 0xbb6   : > { %1914 = vrsqrt.f32 %v1420_v28 }
 0xbc0   : > { %v1915_v31 = vpop.eup %1914 }
 0xbc1   : > { %v1422_v33 = vmul.f32 %v1915_v31, %v1414_v23 }
 0xbc3   : > { %v1427_v37 = vmul.f32 %v1426_v30, %v1422_v33 }
 0xbc5   : > { %v1432_v38 = vadd.f32 %v1431_v35, %v1427_v37 }
 0xbc7   : > { %1433 = vst.msk [vmem:[%s2304_s15] sm:$0xff] %vm581_vm1, %v1432_v38 }
 0xbc8 PF: > { %s2581_s20 = sld [smem:[#allocation11_spill]]  ;;  %s2582_s25 = sld [smem:[#allocation20_spill]] }
 0xbc9   : > { %s2583_s27 = sld [smem:[#allocation17_spill]]  ;;  %s2584_s0 = sld [smem:[#allocation26_spill]] }
 0xbca   : > { %s1448_s3 = sshll.u32 %s2304_s15, 4  ;;  %s2057_s21 = smov [#allocation5]   ;;  %s1449_s3 = int_to_ptr.vmem [resolvable:$true] %s1448_s3 }
 0xbcb   : > { %s1946_s10 = scalar_lea.vmem %s1449_s3, 128  ;;  %s1950_s22 = sshll.u32 %s2057_s21, 4  ;;  %s1951_s22 = int_to_ptr.vmem [resolvable:$false] %s1950_s22 }
 0xbcc   : > { %p1947_p13 = scmp.ne.s32.totalorder %s1449_s3, %s1946_s10  ;;  %s1952_s29 = scalar_lea.vmem %s1951_s22, 256 }
 0xbcd   : > { %p1953_p8 = scmp.lt.s32.totalorder %s1449_s3, %s1951_s22  ;;  %p1954_p12 = scmp.lt.s32.totalorder %s1952_s29, %s1946_s10 }
 0xbce   : > { %s1675_s14 = sshll.u32 %s2581_s20, 7  ;;  %s1435_s4 = scalar_lea.sflag [#allocation4], %s2582_s25 }
 0xbcf   : > { %s2473_s2 = scalar_lea.hbm %s2584_s0, %s1675_s14  ;;  %p2585_p4 = scmp.ne.s32.totalorder %s2583_s27, 0 }
 0xbd0   : > { %p1955_p1 = por %p1954_p12, %p1953_p8 }
 0xbd1   : > { %p1948_p6 = pnand %p1947_p13, %p2585_p4 }
 0xbd3   : > { %p1949_p3 = pneg %p1948_p6 }
 0xbd5   : > { %p1956_p2 = pnand %p1955_p1, %p1949_p3 }
 0xbd7   : > { %1959 = shalt.err (!%p1956_p2)
}
 0xbd8   : > { %s1960_s15 = scalar_lea.hbm %s2473_s2, 128  ;;  %s1964_s28 = scalar_lea.hbm %s2584_s0, 256 }
 0xbd9   : > { %p1961_p5 = scmp.ne.s32.totalorder %s2473_s2, %s1960_s15  ;;  %p1965_p9 = scmp.lt.u32.totalorder %s2473_s2, %s2584_s0 }
 0xbda   : > { %p1966_p0 = scmp.lt.u32.totalorder %s1964_s28, %s1960_s15  ;;  %p1968_p13 = scmp.lt.u32.totalorder %s1960_s15, %s2473_s2 }
 0xbdb   : > { %p1962_p10 = pnand %p1961_p5, %p2585_p4 }
 0xbdc   : > { %p1967_p7 = por %p1966_p0, %p1965_p9 }
 0xbdd   : > { %p1963_p11 = pneg %p1962_p10 }
 0xbde   : > { %p1969_p6 = por %p1968_p13, %p1967_p7 }
 0xbe0   : > { %p1970_p3 = pnand %p1969_p6, %p1963_p11 }
 0xbe2   : > { %1973 = shalt.err (!%p1970_p3)
}
 0xbe3   : > { %1798 = dma.vmem_to_hbm [thread:$0]  (%p2585_p4), %s1449_s3, 128, %s2473_s2, %s1435_s4  }
 0xbe4 PF: > { %s2586_s18 = sld [smem:[#allocation14_spill]]  ;;  %s2587_s19 = sld [smem:[#allocation8_spill]] }
 0xbe5   : > { %s2588_s13 = sld [smem:[#allocation18_spill]] }
 0xbea   : > { %p1809_p8 = scmp.ge.s32.totalorder %s2586_s18, 2  ;;  %s1460_s12 = sand.u32 1, %s2587_s19  }
 0xbeb   : > { %p2589_p12 = scmp.ne.s32.totalorder %s2588_s13, 0  ;;  %s1461_s23 = scalar_lea.sflag [#allocation4], %s1460_s12 }
 0xbed   : > { %p1805_p1 = pnand %p1809_p8, %p2589_p12 }
 0xbef   : > { %2011 = dma.done.wait (!%p1805_p1), %s1461_s23, 128  }
 0xbf0   : > { %2013 = vsyncadd (!%p1805_p1), %s1461_s23, 4294967168  ;;  %s27_s24 = sadd.s32 1, %s2586_s18   ;;  %s2590_s17 = sld [smem:[#allocation9_spill]] }
 0xbf1   : > { %p24_p2 = scmp.ge.s32.totalorder %s27_s24, 6   ;;  %s2591_s18 = sld [smem:[#allocation10_spill]] }
 0xbf2   : > { %s2592_s19 = sld [smem:[#allocation19_spill]]  ;;  %s2593_s20 = sld [smem:[#allocation12_spill]] }
 0xbf3   : > { %s2594_s21 = sld [smem:[#allocation13_spill]]  ;;  %s2595_s22 = sld [smem:[#allocation15_spill]] }
 0xbf4   : > { %s2596_s23 = sld [smem:[#allocation16_spill]]  ;;  %26 = sbr.rel (!%p24_p2) target bundleno = 14 (0xe), region = 148 }
 0xbfb   :  { %1466 = vsyncpa [#allocation3], 1 }
 0xbfc   :  { %1468 = vsyncpa [#allocation3 + $0x1], 1 }
 0xbfd   :  { %1469 = vsyncpa [#allocation4], 1 }
 0xbfe   :  { %1471 = vsyncpa [#allocation4 + $0x1], 1 }

</bundles_post_ra>
